<compile_context>
chip_gen: v7x
topology: tpu7x:2x2x1
jax: 0.10.0
libtpu: 0.0.40
codegen_flags: <defaults>
</compile_context>

<pallas_src>
import functools

import jax
import jax.numpy as jnp
from jax import lax
from jax.experimental import pallas as pl
from jax.experimental.pallas import tpu as pltpu


def _mha_body(x_ref, wq_ref, wk_ref, wv_ref, wo_ref, mask_ref, o_ref,
              k_scr, v_scr, attn_scr, *, num_heads, head_dim, q_tile):
    H, hd, tq = num_heads, head_dim, q_tile

    # K / V projection once per batch element (first q tile of the inner axis)
    # as full-MXU-width matmuls; results persist lane-dense in (T, D) scratch
    # across the "arbitrary" q-tile grid axis.
    @pl.when(pl.program_id(1) == 0)
    def _():
        x_full = x_ref[0]                                   # (T, D), native dtype
        k_scr[...] = jnp.dot(x_full, wk_ref[...],
                             preferred_element_type=jnp.float32).astype(k_scr.dtype)
        v_scr[...] = jnp.dot(x_full, wv_ref[...],
                             preferred_element_type=jnp.float32).astype(v_scr.dtype)

    # Q tile sliced out of the single full-view x ref (no duplicate x input).
    j = pl.program_id(1)
    q_start = pl.multiple_of(j * tq, tq)
    xq = x_ref[0, pl.ds(q_start, tq), :]                    # (tq, D)

    # Fused Q projection across all heads: one (tq, D) @ (D, D) matmul.
    # 1/sqrt(head_dim) already folded into wq by the wrapper.
    q_full = jnp.dot(xq, wq_ref[...],
                     preferred_element_type=jnp.float32).astype(xq.dtype)  # (tq, D)

    for h in range(H):
        lo = h * hd
        qh = q_full[:, lo:lo + hd]                          # (tq, hd)
        kh = k_scr[:, lo:lo + hd]                           # (T,  hd)

        # scores = q @ k^T (contract head_dim), f32 accumulation on the MXU.
        s = lax.dot_general(qh, kh,
                            dimension_numbers=(((1,), (1,)), ((), ())),
                            preferred_element_type=jnp.float32)   # (tq, T)

        if mask_ref is not None:
            # Compare re-done per head so no (tq, T) bool stays live across the
            # whole unrolled head loop.  Bug-for-bug with the PyTorch module:
            # the fill value is -1e-9 (not -1e9).
            s = jnp.where(mask_ref[0] != 0, s, jnp.float32(-1e-9))

        # Numerically stable softmax; EUP approximate reciprocal for the norm.
        s_max = jnp.max(s, axis=-1, keepdims=True)
        e = jnp.exp(s - s_max)
        denom = jnp.sum(e, axis=-1, keepdims=True)
        p = (e * pl.reciprocal(denom, approx=True)).astype(v_scr.dtype)

        # Per-head PV result written head-concatenated into lane-dense scratch.
        attn_scr[:, lo:lo + hd] = jnp.dot(
            p, v_scr[:, lo:lo + hd],
            preferred_element_type=jnp.float32).astype(attn_scr.dtype)

    # Output projection deferred out of the head loop: a single full-width,
    # full-contraction (tq, D) @ (D, D) matmul.
    o_ref[0] = jnp.dot(attn_scr[...], wo_ref[...],
                       preferred_element_type=jnp.float32).astype(o_ref.dtype)


def _mha_kernel_nomask(x, wq, wk, wv, wo, o, k_scr, v_scr, attn_scr,
                       *, num_heads, head_dim, q_tile):
    _mha_body(x, wq, wk, wv, wo, None, o, k_scr, v_scr, attn_scr,
              num_heads=num_heads, head_dim=head_dim, q_tile=q_tile)


def _mha_kernel_masked(x, wq, wk, wv, wo, mask, o, k_scr, v_scr, attn_scr,
                       *, num_heads, head_dim, q_tile):
    _mha_body(x, wq, wk, wv, wo, mask, o, k_scr, v_scr, attn_scr,
              num_heads=num_heads, head_dim=head_dim, q_tile=q_tile)


def _vmem_limit_bytes():
    # Generation-aware VMEM request: ~7/8 of physical (~112 MiB on v5e/v6e,
    # ~56 MiB on v7x); conservative 48 MiB fallback if the query is unavailable.
    try:
        cap = getattr(pltpu.get_tpu_info(), "vmem_capacity_bytes", None)
        if cap:
            return int(min(cap - cap // 8, 112 * 1024 * 1024))
    except Exception:
        pass
    return 48 * 1024 * 1024


def _pick_q_tile(t, vmem_bytes):
    # Bigger q tiles on 128 MiB parts (v5e/v6e), 256 cap on v7x (64 MiB VMEM).
    cap = 512 if vmem_bytes >= 96 * 1024 * 1024 else 256
    if t <= cap:
        return t
    # Largest divisor of t that is a multiple of 8 and <= cap (keeps pl.ds
    # slices in-bounds and blocks sublane-aligned).
    for cand in range(cap, 7, -1):
        if t % cand == 0 and cand % 8 == 0:
            return cand
    return t


def mha_forward(x, wq_t, wk_t, wv_t, wo_t, mask=None, *, num_heads, q_tile=None):
    """x: (B, T, D); w*_t: (D, D) already-transposed nn.Linear weights (W.T)."""
    b, t, d = x.shape
    assert d % num_heads == 0
    H = num_heads
    hd = d // H
    dtype = x.dtype

    vmem_bytes = _vmem_limit_bytes()
    tq = q_tile if q_tile is not None else _pick_q_tile(t, vmem_bytes)
    assert t % tq == 0, "q tile must divide the sequence length"
    n_q = t // tq
    grid = (b, n_q)

    # Scale folded into wq (zero in-kernel work); weights cast to x's dtype so
    # the MXU runs bf16 when the activations are bf16.  Full (D, D) layout:
    # no per-head reshapes, no lane padding when hd < 128.
    scale = 1.0 / (hd ** 0.5)
    wq_s = (wq_t.astype(jnp.float32) * scale).astype(dtype)
    wk_c = wk_t.astype(dtype)
    wv_c = wv_t.astype(dtype)
    wo_c = wo_t.astype(dtype)

    w_spec = pl.BlockSpec((d, d), lambda i, j: (0, 0))
    in_specs = [
        pl.BlockSpec((1, t, d), lambda i, j: (i, 0, 0)),   # x, full view per batch
        w_spec, w_spec, w_spec, w_spec,                    # wq (pre-scaled), wk, wv, wo
    ]
    inputs = [x, wq_s, wk_c, wv_c, wo_c]

    kw = dict(num_heads=H, head_dim=hd, q_tile=tq)
    if mask is None:
        kernel = functools.partial(_mha_kernel_nomask, **kw)
    else:
        if mask.ndim == 4 and mask.shape[1] == 1:          # (B, 1, T, T) -> (B, T, T)
            mask = mask[:, 0]
        if mask.ndim == 2:                                 # (T, T) -> (1, T, T)
            mask = mask[None]
        mask_i8 = (mask != 0).astype(jnp.int8)             # un-broadcast, 1 byte/elem
        if mask_i8.shape[0] == 1:
            m_idx = lambda i, j: (0, j, 0)
        else:
            m_idx = lambda i, j: (i, j, 0)
        in_specs.append(pl.BlockSpec((1, tq, t), m_idx))
        inputs.append(mask_i8)
        kernel = functools.partial(_mha_kernel_masked, **kw)

    return pl.pallas_call(
        kernel,
        out_shape=jax.ShapeDtypeStruct((b, t, d), dtype),
        grid=grid,
        in_specs=in_specs,
        out_specs=pl.BlockSpec((1, tq, d), lambda i, j: (i, j, 0)),
        scratch_shapes=[
            pltpu.VMEM((t, d), dtype),    # K, head-concat lane-dense, per batch
            pltpu.VMEM((t, d), dtype),    # V, head-concat lane-dense, per batch
            pltpu.VMEM((tq, d), dtype),   # per-tile attention output buffer
        ],
        compiler_params=pltpu.CompilerParams(
            # Axis 1 must stay "arbitrary": K/V scratch persistence relies on
            # sequential q tiles within a batch element.
            dimension_semantics=("parallel", "arbitrary"),
            vmem_limit_bytes=vmem_bytes,
        ),
    )(*inputs)


def mha_reference(x, wq_t, wk_t, wv_t, wo_t, mask, num_heads):
    """Plain-JAX re-implementation of the PyTorch forward for verification."""
    b, t, d = x.shape
    hd = d // num_heads
    q = (x @ wq_t).reshape(b, t, num_heads, hd).transpose(0, 2, 1, 3)
    k = (x @ wk_t).reshape(b, t, num_heads, hd).transpose(0, 2, 1, 3)
    v = (x @ wv_t).reshape(b, t, num_heads, hd).transpose(0, 2, 1, 3)
    attn = jnp.einsum("bhtd,bhsd->bhts", q, k) / (hd ** 0.5)
    if mask is not None:
        m = jnp.broadcast_to(mask, (b, t, t))[:, None, :, :]
        attn = jnp.where(m == 0, -1e-9, attn)   # bug-for-bug: -1e-9 as in the module
    attn = jax.nn.softmax(attn, axis=-1)
    out = jnp.einsum("bhts,bhsd->bhtd", attn, v).transpose(0, 2, 1, 3).reshape(b, t, d)
    return out @ wo_t


if __name__ == "__main__":
    # Small config consistent with the module: model_dim=32, num_heads=4.
    batch, seq, model_dim, num_heads = 2, 8, 32, 4

    key = jax.random.PRNGKey(0)
    kx, kq, kk, kv, ko = jax.random.split(key, 5)

    x = jax.random.normal(kx, (batch, seq, model_dim), dtype=jnp.float32)

    # Deterministic "Linear" weights; stored directly as (in, out) == W_pt.T.
    ws = 1.0 / (model_dim ** 0.5)
    wq_t = jax.random.uniform(kq, (model_dim, model_dim), jnp.float32, -ws, ws)
    wk_t = jax.random.uniform(kk, (model_dim, model_dim), jnp.float32, -ws, ws)
    wv_t = jax.random.uniform(kv, (model_dim, model_dim), jnp.float32, -ws, ws)
    wo_t = jax.random.uniform(ko, (model_dim, model_dim), jnp.float32, -ws, ws)

    # 1) mask=None path (mask-free kernel variant, f32).
    out = jax.block_until_ready(
        mha_forward(x, wq_t, wk_t, wv_t, wo_t, mask=None, num_heads=num_heads))
    ref = mha_reference(x, wq_t, wk_t, wv_t, wo_t, None, num_heads)
    assert out.shape == (batch, seq, model_dim)
    # Slightly loosened tolerance: softmax uses the EUP approximate reciprocal.
    assert jnp.allclose(out, ref, atol=2e-2, rtol=2e-2), "no-mask mismatch vs reference"

    # 2) masked path: causal (T, T) mask, passed un-broadcast (int8 inside).
    mask = jnp.tril(jnp.ones((seq, seq), dtype=jnp.int32))
    out_m = jax.block_until_ready(
        mha_forward(x, wq_t, wk_t, wv_t, wo_t, mask=mask, num_heads=num_heads))
    ref_m = mha_reference(x, wq_t, wk_t, wv_t, wo_t, mask, num_heads)
    assert jnp.allclose(out_m, ref_m, atol=2e-2, rtol=2e-2), "masked mismatch vs reference"

    # 3) bf16 path: no in-kernel f32 upcast; MXU runs bf16 with f32 accumulation.
    out_bf = jax.block_until_ready(
        mha_forward(x.astype(jnp.bfloat16), wq_t, wk_t, wv_t, wo_t,
                    mask=None, num_heads=num_heads))
    assert out_bf.dtype == jnp.bfloat16
    assert jnp.allclose(out_bf.astype(jnp.float32), ref, atol=1e-1, rtol=1e-1), "bf16 mismatch"

    print("KERNEL_OK")
</pallas_src>

<mosaic_0001>
module attributes {stable_mosaic.version = 11 : i64} {
  func.func @_mha_kernel_nomask(%arg0: i32, %arg1: i32, %arg2: memref<1x8x32xf32, #tpu.memory_space<vmem>>, %arg3: memref<32x32xf32, #tpu.memory_space<vmem>>, %arg4: memref<32x32xf32, #tpu.memory_space<vmem>>, %arg5: memref<32x32xf32, #tpu.memory_space<vmem>>, %arg6: memref<32x32xf32, #tpu.memory_space<vmem>>, %arg7: memref<1x8x32xf32, #tpu.memory_space<vmem>>, %arg8: memref<8x32xf32, #tpu.memory_space<vmem>>, %arg9: memref<8x32xf32, #tpu.memory_space<vmem>>, %arg10: memref<8x32xf32, #tpu.memory_space<vmem>>) attributes {dimension_semantics = [#tpu.dimension_semantics<parallel>, #tpu.dimension_semantics<arbitrary>], iteration_bounds = array<i64: 2, 1>, scalar_prefetch = 0 : i64, scratch_operands = 3 : i64, tpu.core_type = #tpu.core_type<tc>, window_params = [{transform_indices = @transform_0, window_bounds = array<i64: 1, 8, 32>}, {pipeline_mode = #tpu.pipeline_mode<synchronous>, transform_indices = @transform_1, window_bounds = array<i64: 32, 32>}, {pipeline_mode = #tpu.pipeline_mode<synchronous>, transform_indices = @transform_2, window_bounds = array<i64: 32, 32>}, {pipeline_mode = #tpu.pipeline_mode<synchronous>, transform_indices = @transform_3, window_bounds = array<i64: 32, 32>}, {pipeline_mode = #tpu.pipeline_mode<synchronous>, transform_indices = @transform_4, window_bounds = array<i64: 32, 32>}, {transform_indices = @transform_5, window_bounds = array<i64: 1, 8, 32>}]} {
    %c0_i32 = arith.constant 0 : i32
    %0 = arith.cmpi eq, %arg1, %c0_i32 : i32
    %1 = arith.extui %0 : i1 to i32
    %c0_i32_0 = arith.constant 0 : i32
    %2 = arith.cmpi ne, %1, %c0_i32_0 : i32
    scf.if %2 {
      %c0_49 = arith.constant 0 : index
      %c0_50 = arith.constant 0 : index
      %c0_51 = arith.constant 0 : index
      %80 = vector.load %arg2[%c0_49, %c0_50, %c0_51] : memref<1x8x32xf32, #tpu.memory_space<vmem>>, vector<1x8x32xf32>
      %81 = vector.shape_cast %80 : vector<1x8x32xf32> to vector<8x32xf32>
      %c0_52 = arith.constant 0 : index
      %c0_53 = arith.constant 0 : index
      %82 = vector.load %arg4[%c0_52, %c0_53] : memref<32x32xf32, #tpu.memory_space<vmem>>, vector<32x32xf32>
      %cst_54 = arith.constant dense<0.000000e+00> : vector<8x32xf32>
      %83 = tpu.matmul %81, %82, %cst_54 {dimension_numbers = #tpu.dot_dimension_numbers<[1], [0], [0], [1], [0, 0, 1, 1], [], []>} : vector<8x32xf32>, vector<32x32xf32>, vector<8x32xf32> -> vector<8x32xf32>
      %c0_55 = arith.constant 0 : index
      %c0_56 = arith.constant 0 : index
      %84 = vector.load %arg8[%c0_55, %c0_56] : memref<8x32xf32, #tpu.memory_space<vmem>>, vector<8x32xf32>
      tpu.vector_store %arg8[%c0_55, %c0_56], %83 {strides = array<i32>} : memref<8x32xf32, #tpu.memory_space<vmem>>, vector<8x32xf32>,
      %c0_57 = arith.constant 0 : index
      %c0_58 = arith.constant 0 : index
      %85 = vector.load %arg5[%c0_57, %c0_58] : memref<32x32xf32, #tpu.memory_space<vmem>>, vector<32x32xf32>
      %cst_59 = arith.constant dense<0.000000e+00> : vector<8x32xf32>
      %86 = tpu.matmul %81, %85, %cst_59 {dimension_numbers = #tpu.dot_dimension_numbers<[1], [0], [0], [1], [0, 0, 1, 1], [], []>} : vector<8x32xf32>, vector<32x32xf32>, vector<8x32xf32> -> vector<8x32xf32>
      %c0_60 = arith.constant 0 : index
      %c0_61 = arith.constant 0 : index
      %87 = vector.load %arg9[%c0_60, %c0_61] : memref<8x32xf32, #tpu.memory_space<vmem>>, vector<8x32xf32>
      tpu.vector_store %arg9[%c0_60, %c0_61], %86 {strides = array<i32>} : memref<8x32xf32, #tpu.memory_space<vmem>>, vector<8x32xf32>,
    } else {
    }
    %c8_i32 = arith.constant 8 : i32
    %3 = arith.muli %arg1, %c8_i32 : i32
    %4 = tpu.assume_multiple %3, 8 : i32
    %c0 = arith.constant 0 : index
    %5 = arith.index_cast %4 : i32 to index
    %c0_1 = arith.constant 0 : index
    %6 = vector.load %arg2[%c0, %5, %c0_1] : memref<1x8x32xf32, #tpu.memory_space<vmem>>, vector<1x8x32xf32>
    %7 = vector.shape_cast %6 : vector<1x8x32xf32> to vector<8x32xf32>
    %c0_2 = arith.constant 0 : index
    %c0_3 = arith.constant 0 : index
    %8 = vector.load %arg3[%c0_2, %c0_3] : memref<32x32xf32, #tpu.memory_space<vmem>>, vector<32x32xf32>
    %cst = arith.constant dense<0.000000e+00> : vector<8x32xf32>
    %9 = tpu.matmul %7, %8, %cst {dimension_numbers = #tpu.dot_dimension_numbers<[1], [0], [0], [1], [0, 0, 1, 1], [], []>} : vector<8x32xf32>, vector<32x32xf32>, vector<8x32xf32> -> vector<8x32xf32>
    %10 = vector.extract_strided_slice %9 {offsets = [0, 0], sizes = [8, 8], strides = [1, 1]} : vector<8x32xf32> to vector<8x8xf32>
    %c0_4 = arith.constant 0 : index
    %c0_5 = arith.constant 0 : index
    %11 = vector.load %arg8[%c0_4, %c0_5] : memref<8x32xf32, #tpu.memory_space<vmem>>, vector<8x8xf32>
    %cst_6 = arith.constant dense<0.000000e+00> : vector<8x8xf32>
    %12 = tpu.matmul %10, %11, %cst_6 {dimension_numbers = #tpu.dot_dimension_numbers<[1], [1], [0], [0], [0, 0, 1, 0], [], []>} : vector<8x8xf32>, vector<8x8xf32>, vector<8x8xf32> -> vector<8x8xf32>
    %cst_7 = arith.constant dense<0xFF800000> : vector<8xf32>
    %13 = vector.multi_reduction <maximumf>, %12, %cst_7 [1] : vector<8x8xf32> to vector<8xf32>
    %14 = vector.shape_cast %13 : vector<8xf32> to vector<8x1xf32>
    %15 = vector.broadcast %14 : vector<8x1xf32> to vector<8x8xf32>
    %16 = arith.subf %12, %15 : vector<8x8xf32>
    %17 = math.exp %16 : vector<8x8xf32>
    %cst_8 = arith.constant dense<0.000000e+00> : vector<8xf32>
    %18 = vector.multi_reduction <add>, %17, %cst_8 [1] : vector<8x8xf32> to vector<8xf32>
    %19 = vector.shape_cast %18 : vector<8xf32> to vector<8x1xf32>
    %20 = tpu.reciprocal %19 {approx = true} : vector<8x1xf32> -> vector<8x1xf32>
    %21 = vector.broadcast %20 : vector<8x1xf32> to vector<8x8xf32>
    %22 = arith.mulf %17, %21 : vector<8x8xf32>
    %c0_9 = arith.constant 0 : index
    %c0_10 = arith.constant 0 : index
    %23 = vector.load %arg9[%c0_9, %c0_10] : memref<8x32xf32, #tpu.memory_space<vmem>>, vector<8x8xf32>
    %cst_11 = arith.constant dense<0.000000e+00> : vector<8x8xf32>
    %24 = tpu.matmul %22, %23, %cst_11 {dimension_numbers = #tpu.dot_dimension_numbers<[1], [0], [0], [1], [0, 0, 1, 1], [], []>} : vector<8x8xf32>, vector<8x8xf32>, vector<8x8xf32> -> vector<8x8xf32>
    %c0_12 = arith.constant 0 : index
    %c0_13 = arith.constant 0 : index
    %25 = vector.load %arg10[%c0_12, %c0_13] : memref<8x32xf32, #tpu.memory_space<vmem>>, vector<8x8xf32>
    tpu.vector_store %arg10[%c0_12, %c0_13], %24 {strides = array<i32>} : memref<8x32xf32, #tpu.memory_space<vmem>>, vector<8x8xf32>,
    %26 = vector.extract_strided_slice %9 {offsets = [0, 8], sizes = [8, 8], strides = [1, 1]} : vector<8x32xf32> to vector<8x8xf32>
    %c0_14 = arith.constant 0 : index
    %c8 = arith.constant 8 : index
    %27 = vector.load %arg8[%c0_14, %c8] : memref<8x32xf32, #tpu.memory_space<vmem>>, vector<8x8xf32>
    %cst_15 = arith.constant dense<0.000000e+00> : vector<8x8xf32>
    %28 = tpu.matmul %26, %27, %cst_15 {dimension_numbers = #tpu.dot_dimension_numbers<[1], [1], [0], [0], [0, 0, 1, 0], [], []>} : vector<8x8xf32>, vector<8x8xf32>, vector<8x8xf32> -> vector<8x8xf32>
    %cst_16 = arith.constant dense<0xFF800000> : vector<8xf32>
    %29 = vector.multi_reduction <maximumf>, %28, %cst_16 [1] : vector<8x8xf32> to vector<8xf32>
    %30 = vector.shape_cast %29 : vector<8xf32> to vector<8x1xf32>
    %31 = vector.broadcast %30 : vector<8x1xf32> to vector<8x8xf32>
    %32 = arith.subf %28, %31 : vector<8x8xf32>
    %33 = math.exp %32 : vector<8x8xf32>
    %cst_17 = arith.constant dense<0.000000e+00> : vector<8xf32>
    %34 = vector.multi_reduction <add>, %33, %cst_17 [1] : vector<8x8xf32> to vector<8xf32>
    %35 = vector.shape_cast %34 : vector<8xf32> to vector<8x1xf32>
    %36 = tpu.reciprocal %35 {approx = true} : vector<8x1xf32> -> vector<8x1xf32>
    %37 = vector.broadcast %36 : vector<8x1xf32> to vector<8x8xf32>
    %38 = arith.mulf %33, %37 : vector<8x8xf32>
    %c0_18 = arith.constant 0 : index
    %c8_19 = arith.constant 8 : index
    %39 = vector.load %arg9[%c0_18, %c8_19] : memref<8x32xf32, #tpu.memory_space<vmem>>, vector<8x8xf32>
    %cst_20 = arith.constant dense<0.000000e+00> : vector<8x8xf32>
    %40 = tpu.matmul %38, %39, %cst_20 {dimension_numbers = #tpu.dot_dimension_numbers<[1], [0], [0], [1], [0, 0, 1, 1], [], []>} : vector<8x8xf32>, vector<8x8xf32>, vector<8x8xf32> -> vector<8x8xf32>
    %c0_21 = arith.constant 0 : index
    %c8_22 = arith.constant 8 : index
    %41 = vector.load %arg10[%c0_21, %c8_22] : memref<8x32xf32, #tpu.memory_space<vmem>>, vector<8x8xf32>
    tpu.vector_store %arg10[%c0_21, %c8_22], %40 {strides = array<i32>} : memref<8x32xf32, #tpu.memory_space<vmem>>, vector<8x8xf32>,
    %42 = vector.extract_strided_slice %9 {offsets = [0, 16], sizes = [8, 8], strides = [1, 1]} : vector<8x32xf32> to vector<8x8xf32>
    %c0_23 = arith.constant 0 : index
    %c16 = arith.constant 16 : index
    %43 = vector.load %arg8[%c0_23, %c16] : memref<8x32xf32, #tpu.memory_space<vmem>>, vector<8x8xf32>
    %cst_24 = arith.constant dense<0.000000e+00> : vector<8x8xf32>
    %44 = tpu.matmul %42, %43, %cst_24 {dimension_numbers = #tpu.dot_dimension_numbers<[1], [1], [0], [0], [0, 0, 1, 0], [], []>} : vector<8x8xf32>, vector<8x8xf32>, vector<8x8xf32> -> vector<8x8xf32>
    %cst_25 = arith.constant dense<0xFF800000> : vector<8xf32>
    %45 = vector.multi_reduction <maximumf>, %44, %cst_25 [1] : vector<8x8xf32> to vector<8xf32>
    %46 = vector.shape_cast %45 : vector<8xf32> to vector<8x1xf32>
    %47 = vector.broadcast %46 : vector<8x1xf32> to vector<8x8xf32>
    %48 = arith.subf %44, %47 : vector<8x8xf32>
    %49 = math.exp %48 : vector<8x8xf32>
    %cst_26 = arith.constant dense<0.000000e+00> : vector<8xf32>
    %50 = vector.multi_reduction <add>, %49, %cst_26 [1] : vector<8x8xf32> to vector<8xf32>
    %51 = vector.shape_cast %50 : vector<8xf32> to vector<8x1xf32>
    %52 = tpu.reciprocal %51 {approx = true} : vector<8x1xf32> -> vector<8x1xf32>
    %53 = vector.broadcast %52 : vector<8x1xf32> to vector<8x8xf32>
    %54 = arith.mulf %49, %53 : vector<8x8xf32>
    %c0_27 = arith.constant 0 : index
    %c16_28 = arith.constant 16 : index
    %55 = vector.load %arg9[%c0_27, %c16_28] : memref<8x32xf32, #tpu.memory_space<vmem>>, vector<8x8xf32>
    %cst_29 = arith.constant dense<0.000000e+00> : vector<8x8xf32>
    %56 = tpu.matmul %54, %55, %cst_29 {dimension_numbers = #tpu.dot_dimension_numbers<[1], [0], [0], [1], [0, 0, 1, 1], [], []>} : vector<8x8xf32>, vector<8x8xf32>, vector<8x8xf32> -> vector<8x8xf32>
    %c0_30 = arith.constant 0 : index
    %c16_31 = arith.constant 16 : index
    %57 = vector.load %arg10[%c0_30, %c16_31] : memref<8x32xf32, #tpu.memory_space<vmem>>, vector<8x8xf32>
    tpu.vector_store %arg10[%c0_30, %c16_31], %56 {strides = array<i32>} : memref<8x32xf32, #tpu.memory_space<vmem>>, vector<8x8xf32>,
    %58 = vector.extract_strided_slice %9 {offsets = [0, 24], sizes = [8, 8], strides = [1, 1]} : vector<8x32xf32> to vector<8x8xf32>
    %c0_32 = arith.constant 0 : index
    %c24 = arith.constant 24 : index
    %59 = vector.load %arg8[%c0_32, %c24] : memref<8x32xf32, #tpu.memory_space<vmem>>, vector<8x8xf32>
    %cst_33 = arith.constant dense<0.000000e+00> : vector<8x8xf32>
    %60 = tpu.matmul %58, %59, %cst_33 {dimension_numbers = #tpu.dot_dimension_numbers<[1], [1], [0], [0], [0, 0, 1, 0], [], []>} : vector<8x8xf32>, vector<8x8xf32>, vector<8x8xf32> -> vector<8x8xf32>
    %cst_34 = arith.constant dense<0xFF800000> : vector<8xf32>
    %61 = vector.multi_reduction <maximumf>, %60, %cst_34 [1] : vector<8x8xf32> to vector<8xf32>
    %62 = vector.shape_cast %61 : vector<8xf32> to vector<8x1xf32>
    %63 = vector.broadcast %62 : vector<8x1xf32> to vector<8x8xf32>
    %64 = arith.subf %60, %63 : vector<8x8xf32>
    %65 = math.exp %64 : vector<8x8xf32>
    %cst_35 = arith.constant dense<0.000000e+00> : vector<8xf32>
    %66 = vector.multi_reduction <add>, %65, %cst_35 [1] : vector<8x8xf32> to vector<8xf32>
    %67 = vector.shape_cast %66 : vector<8xf32> to vector<8x1xf32>
    %68 = tpu.reciprocal %67 {approx = true} : vector<8x1xf32> -> vector<8x1xf32>
    %69 = vector.broadcast %68 : vector<8x1xf32> to vector<8x8xf32>
    %70 = arith.mulf %65, %69 : vector<8x8xf32>
    %c0_36 = arith.constant 0 : index
    %c24_37 = arith.constant 24 : index
    %71 = vector.load %arg9[%c0_36, %c24_37] : memref<8x32xf32, #tpu.memory_space<vmem>>, vector<8x8xf32>
    %cst_38 = arith.constant dense<0.000000e+00> : vector<8x8xf32>
    %72 = tpu.matmul %70, %71, %cst_38 {dimension_numbers = #tpu.dot_dimension_numbers<[1], [0], [0], [1], [0, 0, 1, 1], [], []>} : vector<8x8xf32>, vector<8x8xf32>, vector<8x8xf32> -> vector<8x8xf32>
    %c0_39 = arith.constant 0 : index
    %c24_40 = arith.constant 24 : index
    %73 = vector.load %arg10[%c0_39, %c24_40] : memref<8x32xf32, #tpu.memory_space<vmem>>, vector<8x8xf32>
    tpu.vector_store %arg10[%c0_39, %c24_40], %72 {strides = array<i32>} : memref<8x32xf32, #tpu.memory_space<vmem>>, vector<8x8xf32>,
    %c0_41 = arith.constant 0 : index
    %c0_42 = arith.constant 0 : index
    %74 = vector.load %arg10[%c0_41, %c0_42] : memref<8x32xf32, #tpu.memory_space<vmem>>, vector<8x32xf32>
    %c0_43 = arith.constant 0 : index
    %c0_44 = arith.constant 0 : index
    %75 = vector.load %arg6[%c0_43, %c0_44] : memref<32x32xf32, #tpu.memory_space<vmem>>, vector<32x32xf32>
    %cst_45 = arith.constant dense<0.000000e+00> : vector<8x32xf32>
    %76 = tpu.matmul %74, %75, %cst_45 {dimension_numbers = #tpu.dot_dimension_numbers<[1], [0], [0], [1], [0, 0, 1, 1], [], []>} : vector<8x32xf32>, vector<32x32xf32>, vector<8x32xf32> -> vector<8x32xf32>
    %c0_46 = arith.constant 0 : index
    %c0_47 = arith.constant 0 : index
    %c0_48 = arith.constant 0 : index
    %77 = vector.load %arg7[%c0_46, %c0_47, %c0_48] : memref<1x8x32xf32, #tpu.memory_space<vmem>>, vector<1x8x32xf32>
    %78 = vector.shape_cast %77 : vector<1x8x32xf32> to vector<8x32xf32>
    %79 = vector.shape_cast %76 : vector<8x32xf32> to vector<1x8x32xf32>
    tpu.vector_store %arg7[%c0_46, %c0_47, %c0_48], %79 {strides = array<i32>} : memref<1x8x32xf32, #tpu.memory_space<vmem>>, vector<1x8x32xf32>,
    return
  }
  func.func @transform_0(%arg0: i32, %arg1: i32) -> (i32, i32, i32) {
    %c0_i32 = arith.constant 0 : i32
    %c0_i32_0 = arith.constant 0 : i32
    %c0_i32_1 = arith.constant 0 : i32
    return %arg0, %c0_i32, %c0_i32_0 : i32, i32, i32
  }
  func.func @transform_1(%arg0: i32, %arg1: i32) -> (i32, i32) {
    %c0_i32 = arith.constant 0 : i32
    %c0_i32_0 = arith.constant 0 : i32
    %c0_i32_1 = arith.constant 0 : i32
    return %c0_i32, %c0_i32_0 : i32, i32
  }
  func.func @transform_2(%arg0: i32, %arg1: i32) -> (i32, i32) {
    %c0_i32 = arith.constant 0 : i32
    %c0_i32_0 = arith.constant 0 : i32
    %c0_i32_1 = arith.constant 0 : i32
    return %c0_i32, %c0_i32_0 : i32, i32
  }
  func.func @transform_3(%arg0: i32, %arg1: i32) -> (i32, i32) {
    %c0_i32 = arith.constant 0 : i32
    %c0_i32_0 = arith.constant 0 : i32
    %c0_i32_1 = arith.constant 0 : i32
    return %c0_i32, %c0_i32_0 : i32, i32
  }
  func.func @transform_4(%arg0: i32, %arg1: i32) -> (i32, i32) {
    %c0_i32 = arith.constant 0 : i32
    %c0_i32_0 = arith.constant 0 : i32
    %c0_i32_1 = arith.constant 0 : i32
    return %c0_i32, %c0_i32_0 : i32, i32
  }
  func.func @transform_5(%arg0: i32, %arg1: i32) -> (i32, i32, i32) {
    %c0_i32 = arith.constant 0 : i32
    %c0_i32_0 = arith.constant 0 : i32
    return %arg0, %arg1, %c0_i32 : i32, i32, i32
  }
}

</mosaic_0001>

<bundles_post_ra>
// kernel: tpu_custom_call.1
= control target key start
LH: loop header
LB: loop body
LE: loop exit
PB: predicated region body
PF: predicated region fallthrough
CT: control target
= control target key end

     0   :  { %10 = vsyncpa [#allocation6], 0  ;;  %s2440_s0 = inlined_call_operand.hbm [shape: f32[2,8,32], index: 0, kind: input, shape index: {}]   ;;  %s2441_s1 = inlined_call_operand.hbm [shape: f32[32,32], index: 1, kind: input, shape index: {}]   ;;  %s2442_s2 = inlined_call_operand.hbm [shape: f32[32,32], index: 2, kind: input, shape index: {}]   ;;  %s2443_s3 = inlined_call_operand.hbm [shape: f32[32,32], index: 3, kind: input, shape index: {}]   ;;  %s2444_s4 = inlined_call_operand.hbm [shape: f32[32,32], index: 4, kind: input, shape index: {}]   ;;  %s2445_s5 = inlined_call_operand.hbm [shape: f32[2,8,32], index: 5, kind: output, shape index: {}]  }
   0x1   :  { %12 = vsyncpa [#allocation6 + $0x1], 0 }
   0x2   :  { %13 = vsyncpa [#allocation9], 0 }
   0x3   :  { %14 = vsyncpa [#allocation12], 0 }
   0x4   :  { %15 = vsyncpa [#allocation7], 0 }
   0x5   :  { %17 = vsyncpa [#allocation7 + $0x1], 0  ;;  %s2046_s18 = smov 0   ;;  %s2048_s19 = smov 0  }
   0x6   :  { %s2050_s20 = smov 0   ;;  %s2052_s21 = smov 0  }
   0x7   :  { %s2054_s22 = smov 0   ;;  %s2056_s23 = smov 0  }
   0x8 LB: > { %s1454_s24 = sadd.s32 4294967295, %s1997_s23   ;;  %p1456_p0 = scmp.ge.s32.totalorder %s1997_s23, 1  ;;  %s1997_s23 = sphi %s2056_s23, %s23_s23   ;;  %s1993_s22 = sphi %s2054_s22, %s2469_s22   ;;  %s1989_s21 = sphi %s2052_s21, %s2468_s21   ;;  %s1985_s20 = sphi %s2050_s20, %s2467_s20   ;;  %s1981_s19 = sphi %s2048_s19, %s2466_s19   ;;  %s1977_s18 = sphi %s2046_s18, %s2465_s18  }
   0x9   : > { %p2080_p1 = scmp.eq.s32.totalorder %s1454_s24, 0  ;;  %p178_p2 = scmp.lt.s32.totalorder %s1997_s23, 3 }
   0xa   : > { %s1999_s27 = smov [#allocation8]   ;;  %s2000_s30 = smov [#allocation11]  }
   0xb   : > { %s2450_s25 = scalar_select %p2080_p1, 1, 0 }
   0xc   : > { %p2085_p3 = pnand %p1456_p0, %p178_p2  ;;  %s190_s28 = sshll.u32 %s1999_s27, 4  ;;  %s2089_s28 = int_to_ptr.vmem [resolvable:$true] %s190_s28 }
   0xd   : > { %s216_s6 = sshll.u32 %s2000_s30, 4  ;;  %s2001_s7 = smov [#allocation10]   ;;  %s2100_s6 = int_to_ptr.vmem [resolvable:$true] %s216_s6 }
   0xe   : > { %s2451_s26 = scalar_select %p2085_p3, 1, 0 }
   0xf   : > { %p1655_p4 = pneg %p2085_p3  ;;  %s2102_s8 = sshll.u32 %s2001_s7, 4  ;;  %s204_s8 = int_to_ptr.vmem [resolvable:$true] %s2102_s8 }
  0x10   : > { %s1765_s11 = scalar_lea.hbm %s2441_s1, 512 }
  0x11   : > { %p2096_p6 = pnand %p1655_p4, %p2080_p1  ;;  %p1766_p7 = scmp.ne.s32.totalorder %s2441_s1, %s1765_s11 }
  0x12   : > { %p1772_p11 = scmp.lt.u32.totalorder %s1765_s11, %s2441_s1 }
  0x13   : > { %p2112_p8 = pneg %p2096_p6 }
  0x15   : > { %p1768_p9 = pnand %p2112_p8, %p1766_p7 }
  0x17   : > { %p1769_p10 = pneg %p1768_p9 }
  0x19   : > { %p1774_p12 = pnand %p1772_p11, %p1769_p10 }
  0x1b   : > { %1777 = shalt.err (!%p1774_p12)
}
  0x1c   : > { %s1778_s17 = scalar_lea.vmem %s2089_s28, 512  ;;  %p1786_p4 = scmp.lt.s32.totalorder %s2089_s28, %s2089_s28 }
  0x1d   : > { %p1779_p13 = scmp.ne.s32.totalorder %s2089_s28, %s1778_s17  ;;  %p1787_p5 = scmp.lt.s32.totalorder %s1778_s17, %s1778_s17 }
  0x1f   : > { %p1781_p0 = pnand %p1779_p13, %p2112_p8  ;;  %p1788_p7 = por %p1787_p5, %p1786_p4 }
  0x21   : > { %p1782_p2 = pneg %p1781_p0 }
  0x23   : > { %p1789_p9 = pnand %p1788_p7, %p1782_p2 }
  0x25   : > { %1792 = shalt.err (!%p1789_p9)
}
  0x26   : > { %s2002_s27 = smov 128   ;;  %s2003_s30 = smov 8  }
  0x27   : > { %1658 = dma.hbm_to_vmem [thread:$0]  (!%p2096_p6), %s2441_s1, 512, %s2089_s28, [#allocation9], %s2002_s27, %s2002_s27, %s2003_s30  }
  0x28   : > { %s1793_s12 = scalar_lea.hbm %s2443_s3, 512 }
  0x29   : > { %p1794_p5 = scmp.ne.s32.totalorder %s2443_s3, %s1793_s12  ;;  %p1800_p12 = scmp.lt.u32.totalorder %s1793_s12, %s2443_s3 }
  0x2b   : > { %p1796_p10 = pnand %p1794_p5, %p2112_p8 }
  0x2d   : > { %p1797_p11 = pneg %p1796_p10 }
  0x2f   : > { %p1802_p13 = pnand %p1800_p12, %p1797_p11 }
  0x31   : > { %1805 = shalt.err (!%p1802_p13)
}
  0x32   : > { %s1806_s28 = scalar_lea.vmem %s2100_s6, 512  ;;  %p1814_p7 = scmp.lt.s32.totalorder %s2100_s6, %s2100_s6 }
  0x33   : > { %p1807_p0 = scmp.ne.s32.totalorder %s2100_s6, %s1806_s28  ;;  %p1815_p9 = scmp.lt.s32.totalorder %s1806_s28, %s1806_s28 }
  0x35   : > { %p1809_p2 = pnand %p1807_p0, %p2112_p8  ;;  %p1816_p5 = por %p1815_p9, %p1814_p7 }
  0x37   : > { %p1810_p4 = pneg %p1809_p2 }
  0x39   : > { %p1817_p10 = pnand %p1816_p5, %p1810_p4 }
  0x3b   : > { %1820 = shalt.err (!%p1817_p10)
}
  0x3c   : > { %1664 = dma.hbm_to_vmem [thread:$0]  (!%p2096_p6), %s2443_s3, 512, %s2100_s6, [#allocation12], %s2002_s27, %s2002_s27, %s2003_s30  }
  0x3d   : > { %s1821_s12 = scalar_lea.hbm %s2442_s2, 512 }
  0x3e   : > { %p1822_p11 = scmp.ne.s32.totalorder %s2442_s2, %s1821_s12  ;;  %p1828_p0 = scmp.lt.u32.totalorder %s1821_s12, %s2442_s2 }
  0x40   : > { %p1824_p12 = pnand %p1822_p11, %p2112_p8 }
  0x42   : > { %p1825_p13 = pneg %p1824_p12 }
  0x44   : > { %p1830_p2 = pnand %p1828_p0, %p1825_p13 }
  0x46   : > { %1833 = shalt.err (!%p1830_p2)
}
  0x47   : > { %s1834_s28 = scalar_lea.vmem %s204_s8, 512  ;;  %p1842_p5 = scmp.lt.s32.totalorder %s204_s8, %s204_s8 }
  0x48   : > { %p1835_p4 = scmp.ne.s32.totalorder %s204_s8, %s1834_s28  ;;  %p1843_p10 = scmp.lt.s32.totalorder %s1834_s28, %s1834_s28 }
  0x4a   : > { %p1837_p7 = pnand %p1835_p4, %p2112_p8  ;;  %p1844_p3 = por %p1843_p10, %p1842_p5 }
  0x4c   : > { %p1838_p9 = pneg %p1837_p7 }
  0x4e   : > { %p1845_p1 = pnand %p1844_p3, %p1838_p9 }
  0x50   : > { %1848 = shalt.err (!%p1845_p1)
}
  0x51   : > { %1661 = dma.hbm_to_vmem [thread:$0]  (!%p2096_p6), %s2442_s2, 512, %s204_s8, [#allocation9], %s2002_s27, %s2002_s27, %s2003_s30  }
  0x52   : > { %s2004_s9 = smov [#allocation13]   ;;  %s1849_s13 = scalar_lea.hbm %s2444_s4, 512 }
  0x53   : > { %s229_s10 = sshll.u32 %s2004_s9, 4  ;;  %p1850_p1 = scmp.ne.s32.totalorder %s2444_s4, %s1849_s13  ;;  %s230_s10 = int_to_ptr.vmem [resolvable:$true] %s229_s10 }
  0x54   : > { %p1856_p12 = scmp.lt.u32.totalorder %s1849_s13, %s2444_s4 }
  0x55   : > { %p1852_p3 = pnand %p1850_p1, %p2112_p8 }
  0x57   : > { %p1853_p11 = pneg %p1852_p3 }
  0x59   : > { %p1858_p13 = pnand %p1856_p12, %p1853_p11 }
  0x5b   : > { %1861 = shalt.err (!%p1858_p13)
}
  0x5c   : > { %s1862_s8 = scalar_lea.vmem %s230_s10, 512  ;;  %p1870_p7 = scmp.lt.s32.totalorder %s230_s10, %s230_s10 }
  0x5d   : > { %p1863_p0 = scmp.ne.s32.totalorder %s230_s10, %s1862_s8  ;;  %p1871_p9 = scmp.lt.s32.totalorder %s1862_s8, %s1862_s8 }
  0x5f   : > { %p1865_p2 = pnand %p1863_p0, %p2112_p8  ;;  %p1872_p5 = por %p1871_p9, %p1870_p7 }
  0x61   : > { %p1866_p4 = pneg %p1865_p2 }
  0x63   : > { %p1873_p10 = pnand %p1872_p5, %p1866_p4 }
  0x65   : > { %1876 = shalt.err (!%p1873_p10)
}
  0x66   : > { %1667 = dma.hbm_to_vmem [thread:$0]  (!%p2096_p6), %s2444_s4, 512, %s230_s10, [#allocation12], %s2002_s27, %s2002_s27, %s2003_s30  }
  0x67   : > { %s1455_s29 = sadd.s32 4294967294, %s1997_s23   ;;  %s35_s14 = sadd.s32 1, %s1993_s22 }
  0x68   : > { %p37_p8 = scmp.ge.s32.totalorder %s35_s14, 2  ;;  %s42_s9 = sadd.s32 1, %s1985_s20 }
  0x69   : > { %p49_p1 = scmp.ne.s32.totalorder %s1985_s20, %s1981_s19  ;;  %p50_p3 = scmp.eq.s32.totalorder %s1997_s23, 0 }
  0x6a   : > { %s2471_s14 = smov (%p37_p8, %s35_s14), 0  ;;  %p55_p12 = scmp.ne.s32.totalorder %s1981_s19, %s1977_s18 }
  0x6b   : > { %p2213_p11 = por %p50_p3, %p49_p1  ;;  %s39_s27 = ssub.s32 %s1993_s22, %s2471_s14 }
  0x6c   : > { %p165_p6 = scmp.eq.s32.totalorder %s1454_s24, 1  ;;  %p40_p13 = scmp.eq.s32.totalorder %s39_s27, 0 }
  0x6d   : > { %p2455_p0 = scmp.ne.s32.totalorder %s2450_s25, 0  ;;  %p171_p7 = scmp.eq.s32.totalorder %s1455_s29, 1 }
  0x6e   : > { %p2229_p4 = por %p165_p6, %p49_p1  ;;  %p1680_p5 = scmp.lt.s32.totalorder %s1997_s23, 2 }
  0x6f   : > { %p2225_p2 = por %p2455_p0, %p55_p12  ;;  %p2236_p9 = por %p171_p7, %p55_p12 }
  0x70   : > { %s2457_s10 = scalar_select %p2229_p4, 1, 0 }
  0x71   : > { %s2234_s12 = scalar_select %p40_p13, %s1985_s20, %s42_s9  }
  0x72   : > { %s2458_s13 = scalar_select %p2236_p9, 1, 0 }
  0x73   : > { %s243_s15 = sand.u32 1, %s1985_s20   ;;  %s1463_s24 = sshll.u32 %s1993_s22, 7 }
  0x74   : > { %s1462_s16 = sshll.u32 %s243_s15, 3  ;;  %s2246_s8 = scalar_lea.hbm %s2440_s0, %s1463_s24 }
  0x75   : > { %s247_s6 = scalar_lea.vmem [#allocation5], %s1462_s16  ;;  %p2250_p10 = pnand %p1680_p5, %p2213_p11 }
  0x76   : > { %s254_s7 = sshll.u32 %s247_s6, 4  ;;  %s244_s9 = scalar_lea.sflag [#allocation6], %s243_s15  ;;  %s2254_s7 = int_to_ptr.vmem [resolvable:$true] %s254_s7 }
  0x77   : > { %s1877_s27 = scalar_lea.hbm %s2246_s8, 128  ;;  %p1879_p1 = pneg %p2250_p10 }
  0x78   : > { %p1878_p8 = scmp.ne.s32.totalorder %s2246_s8, %s1877_s27  ;;  %s1882_s11 = scalar_lea.hbm %s2440_s0, 256 }
  0x79   : > { %p1883_p11 = scmp.lt.u32.totalorder %s2246_s8, %s2440_s0  ;;  %p1884_p6 = scmp.lt.u32.totalorder %s1882_s11, %s1877_s27 }
  0x7a   : > { %p1880_p3 = pnand %p1879_p1, %p1878_p8  ;;  %p1886_p0 = scmp.lt.u32.totalorder %s1877_s27, %s2246_s8 }
  0x7b   : > { %p1885_p13 = por %p1884_p6, %p1883_p11 }
  0x7c   : > { %p1881_p12 = pneg %p1880_p3 }
  0x7d   : > { %p1887_p7 = por %p1886_p0, %p1885_p13 }
  0x7f   : > { %p1888_p5 = pnand %p1887_p7, %p1881_p12 }
  0x81   : > { %1891 = shalt.err (!%p1888_p5)
}
  0x82   : > { %s1892_s15 = scalar_lea.vmem %s2254_s7, 128  ;;  %s2005_s6 = smov [#allocation5]  }
  0x83   : > { %p1893_p8 = scmp.ne.s32.totalorder %s2254_s7, %s1892_s15  ;;  %s1897_s24 = sshll.u32 %s2005_s6, 4  ;;  %s1898_s24 = int_to_ptr.vmem [resolvable:$false] %s1897_s24 }
  0x84   : > { %s1899_s16 = scalar_lea.vmem %s1898_s24, 256  ;;  %p1900_p4 = scmp.lt.s32.totalorder %s2254_s7, %s1898_s24 }
  0x85   : > { %p1895_p3 = pnand %p1893_p8, %p1879_p1  ;;  %p1901_p11 = scmp.lt.s32.totalorder %s1899_s16, %s1892_s15 }
  0x87   : > { %p1896_p9 = pneg %p1895_p3  ;;  %p1902_p6 = por %p1901_p11, %p1900_p4 }
  0x89   : > { %p1903_p13 = pnand %p1902_p6, %p1896_p9 }
  0x8b   : > { %1906 = shalt.err (!%p1903_p13)
}
  0x8c   : > { %1671 = dma.hbm_to_vmem [thread:$0]  (!%p2250_p10), %s2246_s8, 128, %s2254_s7, %s244_s9  }
  0x8d   : > { %p2460_p12 = scmp.ne.s32.totalorder %s2451_s26, 0 }
  0x8e   : > { %s2284_s27 = sand.u32 (!%p2460_p12), 1, %s1981_s19  }
  0x8f   : > { %263 = sbr.rel (%p2460_p12) target bundleno = 2072 (0x818), region = 40  ;;  %s1465_s11 = sshll.u32 (!%p2460_p12), %s2284_s27, 3 }
  0x90   : > { %s266_s17 = scalar_lea.sflag (!%p2460_p12), [#allocation6], %s2284_s27  ;;  %s269_s28 = scalar_lea.vmem (!%p2460_p12), [#allocation5], %s1465_s11 }
  0x96   : > { %1960 = dma.done.wait (%p2225_p2), %s266_s17, 128  }
  0x97   : > { %1962 = vsyncadd (%p2225_p2), %s266_s17, 4294967168  ;;  %p2461_p4 = scmp.ne.s32.totalorder %s2450_s25, 0 }
  0x99   : > { %1964 = dma.done.wait (%p2461_p4), [#allocation9], 1024  }
  0x9a   : > { %1966 = vsyncadd (%p2461_p4), [#allocation9], 4294966272 }
  0x9b   : > { %1968 = dma.done.wait (%p2461_p4), [#allocation12], 1024  }
  0x9c   : > { %1970 = vsyncadd (%p2461_p4), [#allocation12], 4294966272  ;;  %v2006_v0 = vmov 0.0|0.0   ;;  %vm2007_vm0 = vmmov 0   ;;  %v2008_v1 = vmov 0.0   ;;  %v317_v2 = vld [vmem:[#allocation10] sm:$0xff] }
  0x9d   : > { %1611 = vmatprep.subr.bf16.mxu0 %v2006_v0  ;;  %1535 = vmatprep.mubr.msk.f32.mxu0 %vm2007_vm0, %v2008_v1  ;;  %v318_v3 = vld [vmem:[#allocation10 + $0x8] sm:$0xff]  ;;  %v319_v4 = vld [vmem:[#allocation10 + $0x10] sm:$0xff]  ;;  %v320_v6 = vld [vmem:[#allocation10 + $0x18] sm:$0xff]  ;;  %vm321_vm1 = vcmask 261120   ;;  %vm553_vm2 = vcmask 64512   ;;  %s2009_s25 = smov 120  }
  0x9e   : > { %1617 = vmatprep.subr.bf16.mxu1 %v2006_v0  ;;  %1546 = vmatprep.mubr.msk.f32.mxu1 %vm2007_vm0, %v2008_v1  ;;  %v1612_v5 = vpack.c.bf16 %v318_v3, %v317_v2  ;;  %v1615_v7 = vpack.c.bf16 %v320_v6, %v319_v4  ;;  %v396_v8 = vld [vmem:[#allocation11] sm:$0xff]  ;;  %v397_v9 = vld [vmem:[#allocation11 + $0x8] sm:$0xff]  ;;  %v316_v13 = vld [vmem:[%s269_s28] sm:$0xff]  ;;  %s2010_s26 = smov 112   ;;  %s2011_s30 = smov 104   ;;  %vm889_vm3 = vcmask 130112  }
  0x9f   : > { %v474_v10 = vld [vmem:[#allocation8] sm:$0xff]  ;;  %v475_v11 = vld [vmem:[#allocation8 + $0x8] sm:$0xff]  ;;  %v1618_v12 = vpack.c.bf16 %v397_v9, %v396_v8  ;;  %v476_v15 = vld [vmem:[#allocation8 + $0x10] sm:$0xff]  ;;  %s2012_s8 = smov 8   ;;  %s2013_s7 = smov 16   ;;  %vm1064_vm4 = vcmask 195712  }
  0xa0   : > { %1613 = vmatpush3.bf16.msra.mxu0 %v1612_v5  ;;  %v1624_v14 = vpack.c.bf16 %v475_v11, %v474_v10  ;;  %v477_v16 = vld [vmem:[#allocation8 + $0x18] sm:$0xff]  ;;  %v398_v18 = vld [vmem:[#allocation11 + $0x10] sm:$0xff]  ;;  %s2014_s29 = smov 24   ;;  %vm1239_vm5 = vcmask 261312   ;;  %s1488_s9 = sshll.u32 %s1989_s21, 7 }
  0xa1   : > { %1614 = vmatprep.subr.bf16.mxu0 %v2006_v0  ;;  %1619 = vmatpush3.bf16.msra.mxu1 %v1618_v12  ;;  %v1627_v17 = vpack.c.bf16 %v477_v16, %v476_v15  ;;  %v399_v19 = vld [vmem:[#allocation11 + $0x18] sm:$0xff]  ;;  %s311_s15 = scalar_lea.vmem [#allocation14], %s1465_s11  ;;  %s2390_s17 = scalar_lea.hbm %s2445_s5, %s1488_s9 }
  0xa2   : > { %1620 = vmatprep.subr.bf16.mxu1 %v2006_v0  ;;  %v1621_v20 = vpack.c.bf16 %v399_v19, %v398_v18  ;;  %s1335_s6 = sshll.u32 %s311_s15, 4  ;;  %s1321_s28 = scalar_lea.sflag [#allocation7], %s2284_s27  ;;  %s2392_s6 = int_to_ptr.vmem [resolvable:$true] %s1335_s6 }
  0xa3   : > { %p2462_p9 = scmp.ne.s32.totalorder %s2457_s10, 0  ;;  %s2015_s21 = smov [#allocation14]  }
  0xa4   : > { %1616 = vmatpush3.bf16.msra.mxu0 %v1615_v7  ;;  %s1911_s11 = sshll.u32 %s2015_s21, 4  ;;  %s1912_s11 = int_to_ptr.vmem [resolvable:$false] %s1911_s11 }
  0xa5   : > { %1623 = vmatprep.subr.bf16.mxu0 %v2006_v0  ;;  %1622 = vmatpush3.bf16.msra.mxu1 %v1621_v20  ;;  %p1914_p0 = scmp.lt.s32.totalorder %s2392_s6, %s1912_s11 }
  0xa6   : > { %1560 = vmatprep.subr.mxu1 %v2008_v1 }
  0xa7   : > { %1536 = vmatmul.mubr.msk.f32.vlgmr.msra.gmra.mrb[0].mxu0 %vm321_vm1, %v316_v13 }
  0xa8   : > { %1625 = vmatpush3.bf16.msra.mxu0 %v1624_v14  ;;  %1557 = vmatprep.mubr.msk.f32.mxu0 %vm2007_vm0, %v2008_v1 }
  0xa9   : > { %1626 = vmatprep.subr.bf16.mxu0 %v2006_v0  ;;  %1547 = vmatmul.mubr.msk.f32.vlgmr.msra.gmra.mrb[0].mxu1 %vm321_vm1, %v316_v13 }
  0xaa   : > { %1562 = vmatprep.mubr.msk.f32.mxu1 %vm2007_vm0, %v2008_v1 }
  0xac   : > { %1628 = vmatpush3.bf16.msra.mxu0 %v1627_v17 }
  0xad   : > { %1580 = vmatprep.subr.mxu0 %v2008_v1 }
  0xaf   : > { %1558 = vmatmul.mubr.msk.f32.vlgmr.msra.gmra.mrb[2].mxu0 %vm321_vm1, %v316_v13 }
  0xb0   : > { %1582 = vmatprep.mubr.msk.f32.mxu0 %vm2007_vm0, %v2008_v1 }
 0x17a   : > { %v391_v21 = vpop.f32.mrb[0].mxu0 }
 0x17b   : > { %395 = vst.msk [vmem:[#allocation2] sm:$0xff] %vm321_vm1, %v391_v21  ;;  %v1537_v22 = vpop.f32.mrb[1].mxu0 }
 0x17c   : > { %v466_v26 = vpop.f32.mrb[0].mxu1  ;;  %v1242_v22 = vld [vmem:[#allocation13] sm:$0xff] }
 0x17d   : > { %470 = vst.msk [vmem:[#allocation3] sm:$0xff] %vm321_vm1, %v466_v26  ;;  %v1548_v27 = vpop.f32.mrb[1].mxu1  ;;  %v1245_v26 = vld [vmem:[#allocation13 + $0x18] sm:$0xff] }
 0x182   : > { %v716_v23 = vld [vmem:[#allocation2] sm:$0xff]  ;;  %v548_v24 = vpop.f32.mrb[2].mxu0 }
 0x183   : > { %720 = vrot.lane.b32.xlu1 %v716_v23, %s2009_s25  ;;  %1561 = vmatpush3.xpose.msk.msra.mxu1 %vm553_vm2, %v716_v23  ;;  %v1559_v25 = vpop.f32.mrb[3].mxu0 }
 0x184   : > { %1565 = vmatprep.subr.mxu1 %v2008_v1  ;;  %v2335_v28 = vld [vmem:[#allocation3] sm:$0xff]  ;;  %v1244_v25 = vld [vmem:[#allocation13 + $0x10] sm:$0xff] }
 0x185   : > { %v1633_v27 = vpack.c.bf16 %v1245_v26, %v1244_v25 }
 0x186   : > { %1563 = vmatmul.mubr.msk.f32.vlgmr.msra.gmra.mrb[2].mxu1 %vm553_vm2, %v548_v24 }
 0x187   : > { %717 = vrot.lane.b32.xlu1 %v548_v24, %s2009_s25  ;;  %1567 = vmatprep.mubr.msk.f32.mxu1 %vm2007_vm0, %v2008_v1 }
 0x188   : > { %1566 = vmatpush3.msra.mxu1 %v2335_v28 }
 0x189   : > { %1570 = vmatprep.subr.mxu1 %v2008_v1 }
 0x18b   : > { %892 = vrot.lane.b32.xlu1 %v548_v24, %s2010_s26 }
 0x18f   : > { %1070 = vrot.lane.b32.xlu1 %v716_v23, %s2011_s30 }
 0x193   : > { %1067 = vrot.lane.b32.xlu1 %v548_v24, %s2011_s30 }
 0x1f5   : > { %v721_v37 = vpop.permute.xlu1 %720 }
 0x1f9   : > { %v718_v38 = vpop.permute.xlu1 %717 }
 0x1fd   : > { %v893_v39 = vpop.permute.xlu1 %892 }
 0x201   : > { %v1071_v42 = vpop.permute.xlu1 %1070 }
 0x205   : > { %v1068_v44 = vpop.permute.xlu1 %1067 }
 0x259   : > { %v626_v29 = vpop.f32.mrb[2].mxu1 }
 0x25a   : > { %v1564_v30 = vpop.f32.mrb[3].mxu1  ;;  %v630_v31 = vsel %vm553_vm2, %v626_v29, -inf }
 0x25b   : > { %631 = vmax.xlane.f32.xlu0 %v630_v31 }
 0x2e8   : > { %v632_v32 = vpop.xlane.xlu0 %631 }
 0x2e9   : > { %v633_v33 = vsub.f32 %v626_v29, %v632_v32 }
 0x2eb   : > { %v634_v34 = vmul.f32 1.442695, %v633_v33 }
 0x2ed   : > { %1749 = vpow2.f32 %v634_v34 }
 0x2f7   : > { %v1750_v35 = vpop.eup %1749 }
 0x2f8   : > { %v636_v36 = vsel %vm553_vm2, %v1750_v35, 0.0 }
 0x2f9   : > { %637 = vadd.xlane.f32.xlu0 %v636_v36 }
 0x30f   : > { %895 = vrot.lane.b32.xlu0 %v716_v23, %s2010_s26  ;;  %v1243_v23 = vld [vmem:[#allocation13 + $0x8] sm:$0xff] }
 0x310   : > { %v1630_v24 = vpack.c.bf16 %v1243_v23, %v1242_v22 }
 0x386   : > { %v638_v40 = vpop.xlane.xlu0 %637 }
 0x387   : > { %1751 = vrcp.f32 %v638_v40 }
 0x38a   : > { %v896_v41 = vpop.permute.xlu0 %895 }
 0x38b   : > { %1581 = vmatpush3.xpose.msk.msra.mxu0 %vm553_vm2, %v896_v41 }
 0x38c   : > { %1590 = vmatprep.subr.mxu0 %v2008_v1 }
 0x38e   : > { %1583 = vmatmul.mubr.msk.f32.vlgmr.msra.gmra.mrb[4].mxu0 %vm553_vm2, %v893_v39 }
 0x38f   : > { %1591 = vmatpush3.xpose.msk.msra.mxu0 %vm553_vm2, %v1071_v42  ;;  %1592 = vmatprep.mubr.msk.f32.mxu0 %vm2007_vm0, %v2008_v1 }
 0x390   : > { %1629 = vmatprep.subr.bf16.mxu0 %v2006_v0 }
 0x391   : > { %v1752_v43 = vpop.eup %1751 }
 0x392   : > { %v640_v45 = vmul.f32 %v1752_v43, %v1750_v35  ;;  %1593 = vmatmul.mubr.msk.f32.vlgmr.msra.gmra.mrb[6].mxu0 %vm553_vm2, %v1068_v44 }
 0x393   : > { %1608 = vmatprep.mubr.msk.f32.mxu0 %vm2007_vm0, %v2008_v1  ;;  %1631 = vmatpush3.bf16.msra.mxu0 %v1630_v24 }
 0x394   : > { %1568 = vmatmul.mubr.msk.f32.vlgmr.msra.gmra.mrb[4].mxu1 %vm553_vm2, %v640_v45  ;;  %1632 = vmatprep.subr.bf16.mxu0 %v2006_v0 }
 0x395   : > { %1571 = vmatpush3.xpose.msk.msra.mxu1 %vm553_vm2, %v721_v37  ;;  %1572 = vmatprep.mubr.msk.f32.mxu1 %vm2007_vm0, %v2008_v1 }
 0x396   : > { %1575 = vmatprep.subr.mxu1 %v2008_v1 }
 0x397   : > { %1634 = vmatpush3.bf16.msra.mxu0 %v1633_v27 }
 0x398   : > { %1573 = vmatmul.mubr.msk.f32.vlgmr.msra.gmra.mrb[6].mxu1 %vm553_vm2, %v718_v38 }
 0x399   : > { %1577 = vmatprep.mubr.msk.f32.mxu1 %vm2007_vm0, %v2008_v1 }
 0x461   : > { %v967_v46 = vpop.f32.mrb[4].mxu0 }
 0x462   : > { %v1584_v47 = vpop.f32.mrb[5].mxu0  ;;  %v971_v48 = vsel %vm553_vm2, %v967_v46, -inf }
 0x463   : > { %972 = vmax.xlane.f32.xlu0 %v971_v48 }
 0x465   : > { %v1142_v49 = vpop.f32.mrb[6].mxu0 }
 0x466   : > { %v1594_v50 = vpop.f32.mrb[7].mxu0  ;;  %v1146_v56 = vsel %vm553_vm2, %v1142_v49, -inf }
 0x467   : > { %v711_v51 = vpop.f32.mrb[4].mxu1 }
 0x468   : > { %715 = vst.msk [vmem:[#allocation4] sm:$0xff] %vm553_vm2, %v711_v51  ;;  %v1569_v52 = vpop.f32.mrb[5].mxu1 }
 0x46b   : > { %v792_v53 = vpop.f32.mrb[6].mxu1 }
 0x46c   : > { %v1574_v54 = vpop.f32.mrb[7].mxu1  ;;  %v796_v55 = vsel %vm553_vm2, %v792_v53, -inf }
 0x46d   : > { %797 = vmax.xlane.f32.xlu1 %v796_v55 }
 0x471   : > { %1147 = vmax.xlane.f32.xlu1 %v1146_v56 }
 0x4f0   : > { %v973_v57 = vpop.xlane.xlu0 %972 }
 0x4f1   : > { %v974_v58 = vsub.f32 %v967_v46, %v973_v57 }
 0x4f3   : > { %v975_v59 = vmul.f32 1.442695, %v974_v58 }
 0x4f5   : > { %1753 = vpow2.f32 %v975_v59 }
 0x4fa   : > { %v798_v60 = vpop.xlane.xlu1 %797 }
 0x4fb   : > { %v799_v6 = vsub.f32 %v792_v53, %v798_v60 }
 0x4fd   : > { %v800_v7 = vmul.f32 1.442695, %v799_v6 }
 0x4fe   : > { %v1148_v61 = vpop.xlane.xlu1 %1147 }
 0x4ff   : > { %v1754_v62 = vpop.eup %1753  ;;  %v1149_v63 = vsub.f32 %v1142_v49, %v1148_v61 }
 0x500   : > { %v977_v2 = vsel %vm553_vm2, %v1754_v62, 0.0 }
 0x501   : > { %v1150_v3 = vmul.f32 1.442695, %v1149_v63  ;;  %978 = vadd.xlane.f32.xlu0 %v977_v2 }
 0x503   : > { %1755 = vpow2.f32 %v1150_v3 }
 0x504   : > { %1757 = vpow2.f32 %v800_v7 }
 0x50d   : > { %v1756_v4 = vpop.eup %1755 }
 0x50e   : > { %v1152_v5 = vsel %vm553_vm2, %v1756_v4, 0.0  ;;  %v1758_v8 = vpop.eup %1757 }
 0x50f   : > { %1153 = vadd.xlane.f32.xlu1 %v1152_v5  ;;  %v802_v9 = vsel %vm553_vm2, %v1758_v8, 0.0 }
 0x517   : > { %809 = vrot.lane.b32.xlu0 %v2335_v28, %s2009_s25  ;;  %s1907_s25 = scalar_lea.vmem %s2392_s6, 128 }
 0x518   : > { %p1908_p2 = scmp.ne.s32.totalorder %s2392_s6, %s1907_s25 }
 0x51a   : > { %p1909_p10 = pnand %p1908_p2, %p2462_p9 }
 0x51c   : > { %p1910_p1 = pneg %p1909_p10 }
 0x520   : > { %984 = vrot.lane.b32.xlu1 %v2335_v28, %s2010_s26  ;;  %s1913_s26 = scalar_lea.vmem %s1912_s11, 256 }
 0x521   : > { %p1915_p7 = scmp.lt.s32.totalorder %s1913_s26, %s1907_s25 }
 0x523   : > { %p1916_p5 = por %p1915_p7, %p1914_p0 }
 0x525   : > { %p1917_p8 = pnand %p1916_p5, %p1910_p1 }
 0x544   : > { %803 = vadd.xlane.f32.xlu1 %v802_v9 }
 0x555   : > { %1159 = vrot.lane.b32.xlu1 %v2335_v28, %s2011_s30 }
 0x58e   : > { %v979_v10 = vpop.xlane.xlu0 %978 }
 0x592   : > { %v810_v11 = vpop.permute.xlu0 %809 }
 0x593   : > { %1576 = vmatpush3.msra.mxu1 %v810_v11 }
 0x594   : > { %1585 = vmatprep.subr.mxu1 %v2008_v1 }
 0x59c   : > { %v1154_v12 = vpop.xlane.xlu1 %1153 }
 0x5a0   : > { %v985_v13 = vpop.permute.xlu1 %984 }
 0x5d1   : > { %v804_v14 = vpop.xlane.xlu1 %803 }
 0x5d2   : > { %1759 = vrcp.f32 %v804_v14 }
 0x5d3   : > { %1761 = vrcp.f32 %v979_v10 }
 0x5d4   : > { %1763 = vrcp.f32 %v1154_v12 }
 0x5d5   : > { %v1160_v20 = vpop.permute.xlu1 %1159 }
 0x5dc   : > { %v1760_v15 = vpop.eup %1759 }
 0x5dd   : > { %v806_v16 = vmul.f32 %v1760_v15, %v1758_v8  ;;  %v1762_v17 = vpop.eup %1761 }
 0x5de   : > { %v981_v18 = vmul.f32 %v1762_v17, %v1754_v62  ;;  %v1764_v19 = vpop.eup %1763 }
 0x5df   : > { %1578 = vmatmul.mubr.msk.f32.vlgmr.msra.gmra.mrb[8].mxu1 %vm553_vm2, %v806_v16  ;;  %v1156_v21 = vmul.f32 %v1764_v19, %v1756_v4 }
 0x5e0   : > { %1586 = vmatpush3.msra.mxu1 %v985_v13  ;;  %1587 = vmatprep.mubr.msk.f32.mxu1 %vm2007_vm0, %v2008_v1 }
 0x5e1   : > { %1595 = vmatprep.subr.mxu1 %v2008_v1 }
 0x5e3   : > { %1588 = vmatmul.mubr.msk.f32.vlgmr.msra.gmra.mrb[10].mxu1 %vm553_vm2, %v981_v18 }
 0x5e4   : > { %1596 = vmatpush3.msra.mxu1 %v1160_v20  ;;  %1597 = vmatprep.mubr.msk.f32.mxu1 %vm2007_vm0, %v2008_v1 }
 0x5e7   : > { %1598 = vmatmul.mubr.msk.f32.vlgmr.msra.gmra.mrb[12].mxu1 %vm553_vm2, %v1156_v21 }
 0x6b2   : > { %v881_v28 = vpop.f32.mrb[8].mxu1 }
 0x6b3   : > { %886 = vrot.lane.b32.xlu0 %v881_v28, %s2012_s8  ;;  %v1579_v29 = vpop.f32.mrb[9].mxu1 }
 0x6b6   : > { %v1056_v30 = vpop.f32.mrb[10].mxu1 }
 0x6b7   : > { %1061 = vrot.lane.b32.xlu1 %v1056_v30, %s2013_s7  ;;  %v1589_v1 = vpop.f32.mrb[11].mxu1 }
 0x6ba   : > { %v1231_v31 = vpop.f32.mrb[12].mxu1 }
 0x6bb   : > { %1236 = vrot.lane.b32.xlu0 %v1231_v31, %s2014_s29  ;;  %v1599_v32 = vpop.f32.mrb[13].mxu1 }
 0x725   : > { %v887_v33 = vpop.permute.xlu0 %886 }
 0x726   : > { %890 = vst.msk [vmem:[#allocation4] sm:$0xff] %vm889_vm3, %v887_v33 }
 0x729   : > { %v1062_v0 = vpop.permute.xlu1 %1061 }
 0x72a   : > { %1065 = vst.msk [vmem:[#allocation4] sm:$0xff] %vm1064_vm4, %v1062_v0 }
 0x72d   : > { %v1237_v34 = vpop.permute.xlu0 %1236 }
 0x72e   : > { %1240 = vst.msk [vmem:[#allocation4] sm:$0xff] %vm1239_vm5, %v1237_v34 }
 0x735   : > { %v1241_v35 = vld [vmem:[#allocation4] sm:$0xff] }
 0x736   : > { %1609 = vmatmul.mubr.msk.f32.vlgmr.msra.gmra.mrb[8].mxu0 %vm321_vm1, %v1241_v35 }
 0x809   : > { %v1315_v36 = vpop.f32.mrb[8].mxu0 }
 0x80a   : > { %1319 = vst.msk [vmem:[%s311_s15] sm:$0xff] %vm321_vm1, %v1315_v36  ;;  %v1610_v37 = vpop.f32.mrb[9].mxu0 }
 0x80b   : > { %1920 = shalt.err (!%p1917_p8)
}
 0x80c   : > { %s1921_s27 = scalar_lea.hbm %s2390_s17, 128  ;;  %s1925_s7 = scalar_lea.hbm %s2445_s5, 256 }
 0x80d   : > { %p1922_p3 = scmp.ne.s32.totalorder %s2390_s17, %s1921_s27  ;;  %p1926_p13 = scmp.lt.u32.totalorder %s2390_s17, %s2445_s5 }
 0x80e   : > { %p1927_p12 = scmp.lt.u32.totalorder %s1925_s7, %s1921_s27  ;;  %p1929_p2 = scmp.lt.u32.totalorder %s1921_s27, %s2390_s17 }
 0x80f   : > { %p1923_p11 = pnand %p1922_p3, %p2462_p9 }
 0x810   : > { %p1928_p4 = por %p1927_p12, %p1926_p13 }
 0x811   : > { %p1924_p6 = pneg %p1923_p11 }
 0x812   : > { %p1930_p10 = por %p1929_p2, %p1928_p4 }
 0x814   : > { %p1931_p1 = pnand %p1930_p10, %p1924_p6 }
 0x816   : > { %1934 = shalt.err (!%p1931_p1)
}
 0x817   : > { %1653 = dma.vmem_to_hbm [thread:$0]  (%p2462_p9), %s2392_s6, 128, %s2390_s17, %s1321_s28  }
 0x818 PF: > { %s1347_s15 = sand.u32 1, %s1977_s18   ;;  %p2463_p0 = scmp.ne.s32.totalorder %s2458_s13, 0 }
 0x819   : > { %p2464_p7 = scmp.ge.s32.totalorder %s1997_s23, 2  ;;  %s1348_s24 = scalar_lea.sflag [#allocation7], %s1347_s15 }
 0x81b   : > { %p1673_p5 = pnand %p2464_p7, %p2463_p0 }
 0x81d   : > { %1972 = dma.done.wait (!%p1673_p5), %s1348_s24, 128  }
 0x81e   : > { %1974 = vsyncadd (!%p1673_p5), %s1348_s24, 4294967168  ;;  %s23_s23 = sadd.s32 1, %s1997_s23   ;;  %s2465_s18 = smov %s1981_s19 }
 0x81f   : > { %p20_p8 = scmp.ge.s32.totalorder %s23_s23, 4   ;;  %s2466_s19 = smov %s1985_s20 }
 0x820   : > { %s2467_s20 = smov %s2234_s12  ;;  %s2468_s21 = smov %s1993_s22 }
 0x821   : > { %s2469_s22 = smov %s2471_s14  ;;  %22 = sbr.rel (!%p20_p8) target bundleno = 8 (0x8), region = 106 }
 0x828   :  { %1353 = vsyncpa [#allocation6], 1 }
 0x829   :  { %1355 = vsyncpa [#allocation6 + $0x1], 1 }
 0x82a   :  { %1356 = vsyncpa [#allocation9], 1 }
 0x82b   :  { %1357 = vsyncpa [#allocation12], 1 }
 0x82c   :  { %1358 = vsyncpa [#allocation7], 1 }
 0x82d   :  { %1360 = vsyncpa [#allocation7 + $0x1], 1 }

</bundles_post_ra>
